<compile_context>
chip_gen: v5e
topology: v5e:2x2
jax: 0.10.0
libtpu: 0.0.40
codegen_flags: <defaults>
</compile_context>

<pallas_src>
import jax
import jax.numpy as jnp
from jax.experimental import pallas as pl
from jax.experimental.pallas import tpu as pltpu


def _cdiv(a, b):
    return -(-a // b)


def _round_up(v, m):
    return _cdiv(v, m) * m


def _quad_sigmoid_kernel(params_ref, xt_ref, o_ref):
    # params_ref: SMEM (6,)        -> [w1, w2, w3, w4, w5, b]
    # xt_ref:     VMEM (2, TR, C)  -> feature-major tile
    # o_ref:      VMEM (TR, C)
    w1 = params_ref[0]
    w2 = params_ref[1]
    w3 = params_ref[2]
    w4 = params_ref[3]
    w5 = params_ref[4]
    b = params_ref[5]

    x1 = xt_ref[0]  # (TR, C)
    x2 = xt_ref[1]  # (TR, C)

    # Factored quadratic: 5 mul + 5 add on the VPU.
    z = x1 * (w1 * x1 + w3 * x2 + w4) + x2 * (w2 * x2 + w5) + b

    # sigmoid: exp on the EUP, exact reciprocal (keeps 1e-5/1e-6 tolerances).
    o_ref[...] = 1.0 / (1.0 + jnp.exp(-z))


def quadratic_network_forward(x, params, *, block_rows=256, lane_cols=512):
    """x: (N, 2) float32, params: (6,) float32 -> (N,) float32."""
    n = x.shape[0]

    c = lane_cols
    tr = block_rows
    # Shrink the tile for small inputs to avoid gratuitous padding; keep the
    # (8, 128) layout constraint (tr multiple of 8, c multiple of 128).
    if n < tr * c:
        c = 128
        tr = min(tr, max(8, _round_up(_cdiv(n, c), 8)))

    rows = _round_up(_cdiv(n, c), tr)   # total sublane rows, multiple of tr
    n_pad = rows * c
    grid = rows // tr

    # Feature-major, lane/sublane-dense slab: (2, rows, c).
    xt = jnp.transpose(x)               # (2, N)
    pad = n_pad - n
    if pad:
        xt = jnp.pad(xt, ((0, 0), (0, pad)))
    xt = xt.reshape(2, rows, c)

    out = pl.pallas_call(
        _quad_sigmoid_kernel,
        out_shape=jax.ShapeDtypeStruct((rows, c), jnp.float32),
        grid=(grid,),
        in_specs=[
            pl.BlockSpec(memory_space=pltpu.MemorySpace.SMEM),          # params
            pl.BlockSpec((2, tr, c), lambda i: (0, i, 0)),              # x^T tile
        ],
        out_specs=pl.BlockSpec((tr, c), lambda i: (i, 0)),
        compiler_params=pltpu.CompilerParams(
            dimension_semantics=("parallel",),
        ),
        cost_estimate=pl.CostEstimate(
            flops=10 * n_pad,
            transcendentals=n_pad,
            bytes_accessed=12 * n_pad,
        ),
    )(params, xt)

    return out.reshape(n_pad)[:n]


def _reference(x, params):
    w1, w2, w3, w4, w5, b = [params[i] for i in range(6)]
    x1, x2 = x[:, 0], x[:, 1]
    z = w1 * x1 ** 2 + w2 * x2 ** 2 + w3 * x1 * x2 + w4 * x1 + w5 * x2 + b
    return jax.nn.sigmoid(z)


if __name__ == "__main__":
    key = jax.random.PRNGKey(0)
    k_x, k_p = jax.random.split(key)

    # Small shape consistent with the module: batch of 8 two-feature points.
    N = 8
    x = jax.random.normal(k_x, (N, 2), dtype=jnp.float32)
    # Deterministic stand-ins for torch.randn(1) params: [w1, w2, w3, w4, w5, b]
    params = jax.random.normal(k_p, (6,), dtype=jnp.float32)

    out = jax.block_until_ready(quadratic_network_forward(x, params))
    ref = _reference(x, params)
    assert out.shape == (N,)
    assert jnp.allclose(out, ref, atol=1e-5, rtol=1e-5), (out, ref)

    # Exercise the multi-block grid + padded-tail path as well.
    N2 = 2048 + 37
    x2 = jax.random.normal(k_x, (N2, 2), dtype=jnp.float32)
    out2 = jax.block_until_ready(
        quadratic_network_forward(x2, params, block_rows=8, lane_cols=128))
    ref2 = _reference(x2, params)
    assert out2.shape == (N2,)
    assert jnp.allclose(out2, ref2, atol=1e-5, rtol=1e-5)

    print("KERNEL_OK")
</pallas_src>

<mosaic_0001>
module attributes {stable_mosaic.version = 11 : i64} {
  func.func @_quad_sigmoid_kernel(%arg0: i32, %arg1: memref<6xf32, #tpu.memory_space<smem>>, %arg2: memref<2x8x128xf32, #tpu.memory_space<vmem>>, %arg3: memref<8x128xf32, #tpu.memory_space<vmem>>) attributes {dimension_semantics = [#tpu.dimension_semantics<parallel>], iteration_bounds = array<i64: 1>, scalar_prefetch = 0 : i64, scratch_operands = 0 : i64, tpu.core_type = #tpu.core_type<tc>, window_params = [{transform_indices = @transform_0, window_bounds = array<i64: 6>}, {transform_indices = @transform_1, window_bounds = array<i64: 2, 8, 128>}, {transform_indices = @transform_2, window_bounds = array<i64: 8, 128>}]} {
    %c0 = arith.constant 0 : index
    %0 = memref.load %arg1[%c0] : memref<6xf32, #tpu.memory_space<smem>>
    %c1 = arith.constant 1 : index
    %1 = memref.load %arg1[%c1] : memref<6xf32, #tpu.memory_space<smem>>
    %c2 = arith.constant 2 : index
    %2 = memref.load %arg1[%c2] : memref<6xf32, #tpu.memory_space<smem>>
    %c3 = arith.constant 3 : index
    %3 = memref.load %arg1[%c3] : memref<6xf32, #tpu.memory_space<smem>>
    %c4 = arith.constant 4 : index
    %4 = memref.load %arg1[%c4] : memref<6xf32, #tpu.memory_space<smem>>
    %c5 = arith.constant 5 : index
    %5 = memref.load %arg1[%c5] : memref<6xf32, #tpu.memory_space<smem>>
    %c0_0 = arith.constant 0 : index
    %c0_1 = arith.constant 0 : index
    %c0_2 = arith.constant 0 : index
    %6 = vector.load %arg2[%c0_0, %c0_1, %c0_2] : memref<2x8x128xf32, #tpu.memory_space<vmem>>, vector<1x8x128xf32>
    %7 = vector.shape_cast %6 : vector<1x8x128xf32> to vector<8x128xf32>
    %c1_3 = arith.constant 1 : index
    %c0_4 = arith.constant 0 : index
    %c0_5 = arith.constant 0 : index
    %8 = vector.load %arg2[%c1_3, %c0_4, %c0_5] : memref<2x8x128xf32, #tpu.memory_space<vmem>>, vector<1x8x128xf32>
    %9 = vector.shape_cast %8 : vector<1x8x128xf32> to vector<8x128xf32>
    %10 = vector.broadcast %0 : f32 to vector<8x128xf32>
    %11 = arith.mulf %10, %7 : vector<8x128xf32>
    %12 = vector.broadcast %2 : f32 to vector<8x128xf32>
    %13 = arith.mulf %12, %9 : vector<8x128xf32>
    %14 = arith.addf %11, %13 : vector<8x128xf32>
    %15 = vector.broadcast %3 : f32 to vector<8x128xf32>
    %16 = arith.addf %14, %15 : vector<8x128xf32>
    %17 = arith.mulf %7, %16 : vector<8x128xf32>
    %18 = vector.broadcast %1 : f32 to vector<8x128xf32>
    %19 = arith.mulf %18, %9 : vector<8x128xf32>
    %20 = vector.broadcast %4 : f32 to vector<8x128xf32>
    %21 = arith.addf %19, %20 : vector<8x128xf32>
    %22 = arith.mulf %9, %21 : vector<8x128xf32>
    %23 = arith.addf %17, %22 : vector<8x128xf32>
    %24 = vector.broadcast %5 : f32 to vector<8x128xf32>
    %25 = arith.addf %23, %24 : vector<8x128xf32>
    %cst = arith.constant 0.000000e+00 : f32
    %26 = vector.broadcast %cst : f32 to vector<8x128xf32>
    %27 = arith.subf %26, %25 : vector<8x128xf32>
    %28 = math.exp %27 : vector<8x128xf32>
    %cst_6 = arith.constant 1.000000e+00 : f32
    %29 = vector.broadcast %cst_6 : f32 to vector<8x128xf32>
    %30 = arith.addf %29, %28 : vector<8x128xf32>
    %cst_7 = arith.constant 1.000000e+00 : f32
    %31 = vector.broadcast %cst_7 : f32 to vector<8x128xf32>
    %32 = arith.divf %31, %30 : vector<8x128xf32>
    %c0_8 = arith.constant 0 : index
    %c0_9 = arith.constant 0 : index
    %33 = vector.load %arg3[%c0_8, %c0_9] : memref<8x128xf32, #tpu.memory_space<vmem>>, vector<8x128xf32>
    tpu.vector_store %arg3[%c0_8, %c0_9], %32 {strides = array<i32>} : memref<8x128xf32, #tpu.memory_space<vmem>>, vector<8x128xf32>,
    return
  }
  func.func @transform_0(%arg0: i32) -> i32 {
    %c0_i32 = arith.constant 0 : i32
    %c0_i32_0 = arith.constant 0 : i32
    return %c0_i32 : i32
  }
  func.func @transform_1(%arg0: i32) -> (i32, i32, i32) {
    %c0_i32 = arith.constant 0 : i32
    %c0_i32_0 = arith.constant 0 : i32
    %c0_i32_1 = arith.constant 0 : i32
    return %c0_i32, %arg0, %c0_i32_0 : i32, i32, i32
  }
  func.func @transform_2(%arg0: i32) -> (i32, i32) {
    %c0_i32 = arith.constant 0 : i32
    %c0_i32_0 = arith.constant 0 : i32
    return %arg0, %c0_i32 : i32, i32
  }
}

</mosaic_0001>

<bundles_post_ra>
// kernel: tpu_custom_call.1
= control target key start
LH: loop header
LB: loop body
LE: loop exit
PB: predicated region body
PF: predicated region fallthrough
CT: control target
= control target key end

     0   :  { %7 = vsyncpa [#allocation5], 0  ;;  %s213_s0 = inlined_call_operand.hbm [shape: f32[6], index: 0, kind: input, shape index: {}]   ;;  %s214_s1 = inlined_call_operand.hbm [shape: f32[2,8,128], index: 1, kind: input, shape index: {}]   ;;  %s215_s2 = inlined_call_operand.hbm [shape: f32[8,128], index: 2, kind: output, shape index: {}]  }
   0x1   :  { %8 = vsyncpa [#allocation3], 0 }
   0x2   :  { %9 = vsyncpa [#allocation4], 0  ;;  %s15_s11 = sshll.u32 %s213_s0, 4  ;;  %s23_s14 = sshll.u32 %s214_s1, 4  ;;  %s16_s11 = int_to_ptr.hbm [resolvable:$true] %s15_s11  ;;  %s24_s14 = int_to_ptr.hbm [resolvable:$true] %s23_s14 }
   0x3   :  { %s184_s15 = smov [#allocation2]   ;;  %s185_s16 = smov [#allocation6]  }
   0x4   :  { %18 = dma.hbm_to_smem %s16_s11, 16, %s184_s15, [#allocation5]  }
   0x5   :  { %s25_s17 = sshll.u32 %s185_s16, 4  ;;  %s186_s18 = smov 128   ;;  %s26_s17 = int_to_ptr.vmem [resolvable:$true] %s25_s17 }
   0x6   :  { %s187_s19 = smov 8  }
   0x7   :  { %31 = dma.hbm_to_vmem [thread:$0]  %s24_s14, 256, %s26_s17, [#allocation3], %s186_s18, %s186_s18, %s187_s19  }
   0x8   :  { %178 = dma.done.wait [#allocation5], 16  }
   0x9   :  { %179 = vsyncadd [#allocation5], 4294967280 }
   0xa   :  { %180 = dma.done.wait [#allocation3], 256  }
   0xb   :  { %181 = vsyncadd [#allocation3], 4294967040 }
   0xc   :  { %40 = sfence }
   0xd   :  { %s41_s0 = sld [smem:[#allocation2]]  ;;  %v47_v0 = vld [vmem:[#allocation6] sm:$0xff]  ;;  %v49_v1 = vld [vmem:[#allocation6 + $0x8] sm:$0xff]  ;;  %s188_s24 = smov [#allocation7]  }
   0xe   :  { %s104_s20 = sld [smem:[#allocation2 + $0x1]]  ;;  %s91_s25 = sshll.u32 %s188_s24, 4  ;;  %s92_s25 = int_to_ptr.vmem [resolvable:$true] %s91_s25 }
   0xf   :  { %s105_s21 = sld [smem:[#allocation2 + $0x2]]  ;;  %s93_s28 = sshll.u32 %s215_s2, 4  ;;  %s94_s28 = int_to_ptr.hbm [resolvable:$true] %s93_s28 }
  0x10   :  { %s106_s22 = sld [smem:[#allocation2 + $0x3]] }
  0x11   :  { %s107_s23 = sld [smem:[#allocation2 + $0x4]] }
  0x12   :  { %s108_s1 = sld [smem:[#allocation2 + $0x5]] }
  0x13   :  { %v50_v2 = vstv %s41_s0 }
  0x14   :  { %v51_v3 = vmul.f32 %v50_v2, %v47_v0  ;;  %v58_v4 = vstv %s104_s20 }
  0x15   :  { %v52_v5 = vstv %s105_s21  ;;  %v59_v6 = vmul.f32 %v58_v4, %v49_v1 }
  0x16   :  { %v53_v7 = vmul.f32 %v52_v5, %v49_v1  ;;  %v55_v8 = vstv %s106_s22 }
  0x17   :  { %v60_v9 = vstv %s107_s23 }
  0x18   :  { %v54_v10 = vadd.f32 %v53_v7, %v51_v3  ;;  %v61_v11 = vadd.f32 %v60_v9, %v59_v6  ;;  %v64_v15 = vstv %s108_s1 }
  0x1a   :  { %v56_v12 = vadd.f32 %v55_v8, %v54_v10  ;;  %v62_v13 = vmul.f32 %v61_v11, %v49_v1 }
  0x1c   :  { %v57_v14 = vmul.f32 %v56_v12, %v47_v0 }
  0x1e   :  { %v63_v16 = vadd.f32 %v62_v13, %v57_v14 }
  0x20   :  { %v65_v17 = vadd.f32 %v64_v15, %v63_v16 }
  0x22   :  { %v66_v18 = vsub.f32 0.0, %v65_v17 }
  0x24   :  { %v67_v19 = vmul.f32 1.442695, %v66_v18 }
  0x26   :  { %114 = vpow2.f32 %v67_v19 }
  0x2c   :  { %v115_v20 = vpop.eup %114 }
  0x2d   :  { %v69_v21 = vadd.f32 1.0, %v115_v20 }
  0x2f   :  { %116 = vrcp.f32 %v69_v21  ;;  %v81_v24 = vand.u32 2147483648, %v69_v21  ;;  %vm75_vm0 = vweird.f32 %v69_v21  ;;  %v79_v26 = vand.u32 2147483647, %v69_v21 }
  0x31   :  { %v82_v28 = vor.u32 1.1754944e-38, %v81_v24  ;;  %vm80_vm3 = vcmp.eq.f32.partialorder %v79_v26, 8.507059e+37 }
  0x35   :  { %v117_v22 = vpop.eup %116 }
  0x36   :  { %v71_v23 = vmul.f32 %v117_v22, %v69_v21  ;;  %vm76_vm1 = vweird.f32 %v117_v22 }
  0x37   :  { %vm77_vm2 = vmor %vm75_vm0, %vm76_vm1 }
  0x38   :  { %v72_v25 = vsub.f32 1.0, %v71_v23 }
  0x3a   :  { %v73_v27 = vmul.f32 %v117_v22, %v72_v25 }
  0x3c   :  { %v74_v29 = vadd.f32 %v117_v22, %v73_v27 }
  0x3e   :  { %v78_v30 = vsel %vm77_vm2, %v117_v22, %v74_v29 }
  0x3f   :  { %v83_v31 = vsel %vm80_vm3, %v82_v28, %v78_v30 }
  0x40   :  { %85 = vst [vmem:[#allocation7] sm:$0xff] %v83_v31 }
  0x41   :  { %96 = dma.vmem_to_hbm [thread:$0]  %s92_s25, 128, %s94_s28, [#allocation4]  }
  0x42   :  { %182 = dma.done.wait [#allocation4], 128  }
  0x43   :  { %183 = vsyncadd [#allocation4], 4294967168 }
  0x44   :  { %101 = vsyncpa [#allocation3], 1 }
  0x45   :  { %102 = vsyncpa [#allocation4], 1 }
  0x46   :  { %103 = vsyncpa [#allocation5], 1 }

</bundles_post_ra>
